<compile_context>
chip_gen: v7x
topology: tpu7x:2x2x1
jax: 0.10.0
libtpu: 0.0.40
codegen_flags: <defaults>
</compile_context>

<pallas_src>
import jax
import jax.numpy as jnp
from jax import lax
from jax.experimental import pallas as pl
from jax.experimental.pallas import tpu as pltpu

OBSV_DIM = 26
ACTION_DIM = 3
HIDDEN = 64


def _lstm_linear_kernel(x_ref, wpk_ref, wout_ref, out_ref, xg_sc):
    TBp, D = x_ref.shape
    Bp, A = out_ref.shape
    T = TBp // Bp
    H4 = wpk_ref.shape[1]
    H = H4 // 4
    # Static row offsets inside the packed parameter slab (must match wrapper).
    w_hh_off = ((D + 7) // 8) * 8
    b_off = w_hh_off + H

    # ---- Prologue (runs once, off the serial recurrence path) ----------------
    # Input projection for every timestep at once, pre-scaled bias folded in:
    # rows t*Bp .. t*Bp+Bp-1 of xg_sc hold the precomputed gates for step t.
    xg_sc[...] = (jnp.dot(x_ref[...], wpk_ref[0:D, :],
                          preferred_element_type=jnp.float32)
                  + wpk_ref[b_off:b_off + 1, :])

    whh = wpk_ref[w_hh_off:w_hh_off + H, :]          # (H, 4H), loaded once

    # Hoisted per-lane affine that turns a single tanh into sigmoid for the
    # i/f/o gates (whose pre-activations were pre-scaled by 0.5 in the wrapper)
    # and leaves the g gate as a plain tanh.  PyTorch order [i | f | g | o].
    lane = lax.broadcasted_iota(jnp.int32, (Bp, H4), 1)
    is_g = (lane >= 2 * H) & (lane < 3 * H)
    act_scale = jnp.where(is_g, 1.0, 0.5)
    act_off = jnp.where(is_g, 0.0, 0.5)

    # ---- Serial recurrence: only h @ W_hh + elementwise per step --------------
    def step(t, carry):
        h, c = carry
        row = pl.multiple_of(t * Bp, Bp)
        gates = xg_sc[pl.ds(row, Bp), :] + jnp.dot(
            h, whh, preferred_element_type=jnp.float32)       # (Bp, 4H)
        act = jnp.tanh(gates) * act_scale + act_off           # one EUP pass
        i_g = act[:, 0 * H:1 * H]
        f_g = act[:, 1 * H:2 * H]
        g_g = act[:, 2 * H:3 * H]
        o_g = act[:, 3 * H:4 * H]
        c_new = f_g * c + i_g * g_g
        h_new = o_g * jnp.tanh(c_new)
        return (h_new, c_new)

    h0 = jnp.zeros((Bp, H), jnp.float32)
    c0 = jnp.zeros((Bp, H), jnp.float32)
    h_last, _ = lax.fori_loop(0, T, step, (h0, c0), unroll=True)

    # ---- Fused output Linear on the final hidden state ------------------------
    out_ref[...] = (jnp.dot(h_last, wout_ref[0:H, :],
                            preferred_element_type=jnp.float32)
                    + wout_ref[H:H + 1, :]).astype(out_ref.dtype)


def rnn_forward(x, params):
    """x: (B, T, D) float32 (batch_first).  Returns (B, ACTION_DIM) float32
    == RNN.forward(x) of the reference PyTorch module."""
    B, T, D = x.shape
    assert T >= 1, "LSTM forward needs at least one timestep"
    H = params["w_hh"].shape[0]
    A = params["w_out"].shape[1]
    Bp = ((B + 7) // 8) * 8                      # pad batch to f32 sublane multiple

    x_tm = jnp.transpose(x, (1, 0, 2))           # time-major (T, B, D)
    if Bp != B:
        x_tm = jnp.pad(x_tm, ((0, 0), (0, Bp - B), (0, 0)))
    x2d = x_tm.reshape(T * Bp, D)                # rows grouped by timestep

    # sigmoid(z) = 0.5*tanh(z/2) + 0.5 -> pre-scale the i/f/o gate columns of
    # the weights and the fused bias by 0.5 so the kernel needs only one tanh.
    col = jnp.arange(4 * H)
    is_g = (col >= 2 * H) & (col < 3 * H)
    col_scale = jnp.where(is_g, 1.0, 0.5).astype(jnp.float32)

    w_ih_s = params["w_ih"] * col_scale[None, :]
    w_hh_s = params["w_hh"] * col_scale[None, :]
    bias_s = (params["b_ih"] + params["b_hh"]) * col_scale

    # Pack W_ih / W_hh / bias into a single slab (8-row-aligned offsets).
    w_hh_off = ((D + 7) // 8) * 8
    b_off = w_hh_off + H
    pack_rows = ((b_off + 1 + 7) // 8) * 8
    wpk = jnp.zeros((pack_rows, 4 * H), jnp.float32)
    wpk = wpk.at[0:D, :].set(w_ih_s)
    wpk = wpk.at[w_hh_off:w_hh_off + H, :].set(w_hh_s)
    wpk = wpk.at[b_off, :].set(bias_s)

    # Pack the output Linear (W_out on top, b_out as the next row).
    out_rows = ((H + 1 + 7) // 8) * 8
    wout = jnp.zeros((out_rows, A), jnp.float32)
    wout = wout.at[0:H, :].set(params["w_out"])
    wout = wout.at[H, :].set(params["b_out"])

    out_p = pl.pallas_call(
        _lstm_linear_kernel,
        out_shape=jax.ShapeDtypeStruct((Bp, A), jnp.float32),
        grid_spec=pltpu.PrefetchScalarGridSpec(
            num_scalar_prefetch=0,
            grid=(1,),
            in_specs=[
                pl.BlockSpec((T * Bp, D), lambda i: (0, 0)),         # x, all t
                pl.BlockSpec((pack_rows, 4 * H), lambda i: (0, 0)),  # LSTM slab
                pl.BlockSpec((out_rows, A), lambda i: (0, 0)),       # out slab
            ],
            out_specs=pl.BlockSpec((Bp, A), lambda i: (0, 0)),
            scratch_shapes=[pltpu.VMEM((T * Bp, 4 * H), jnp.float32)],
        ),
        compiler_params=pltpu.CompilerParams(
            dimension_semantics=("arbitrary",)),
    )(x2d, wpk, wout)
    return out_p[:B]


def init_params(key, obsv_dim=OBSV_DIM, hidden=HIDDEN, action_dim=ACTION_DIM):
    """Deterministic init (uniform +/-1/sqrt(hidden), like PyTorch defaults)."""
    ks = jax.random.split(key, 6)
    bound = 1.0 / jnp.sqrt(jnp.float32(hidden))
    u = lambda k, shape: jax.random.uniform(k, shape, jnp.float32, -bound, bound)
    return {
        # stored pre-transposed so the kernel does x @ W
        "w_ih": u(ks[0], (obsv_dim, 4 * hidden)),
        "w_hh": u(ks[1], (hidden, 4 * hidden)),
        "b_ih": u(ks[2], (4 * hidden,)),
        "b_hh": u(ks[3], (4 * hidden,)),
        "w_out": u(ks[4], (hidden, action_dim)),
        "b_out": u(ks[5], (action_dim,)),
    }


def rnn_forward_ref(x, params):
    """Pure-JAX reference of the same LSTM + Linear forward (unscaled math)."""
    B, T, D = x.shape
    H = params["w_hh"].shape[0]
    h = jnp.zeros((B, H), jnp.float32)
    c = jnp.zeros((B, H), jnp.float32)
    bias = params["b_ih"] + params["b_hh"]
    for t in range(T):
        g = x[:, t, :] @ params["w_ih"] + h @ params["w_hh"] + bias
        i_g = jax.nn.sigmoid(g[:, 0 * H:1 * H])
        f_g = jax.nn.sigmoid(g[:, 1 * H:2 * H])
        g_g = jnp.tanh(g[:, 2 * H:3 * H])
        o_g = jax.nn.sigmoid(g[:, 3 * H:4 * H])
        c = f_g * c + i_g * g_g
        h = o_g * jnp.tanh(c)
    return h @ params["w_out"] + params["b_out"]


if __name__ == "__main__":
    key = jax.random.PRNGKey(0)
    k_par, k_x = jax.random.split(key)

    B, T = 2, 8
    params = init_params(k_par)
    x = jax.random.normal(k_x, (B, T, OBSV_DIM), jnp.float32)

    out = rnn_forward(x, params)
    out = jax.block_until_ready(out)

    ref = rnn_forward_ref(x, params)
    assert out.shape == (B, ACTION_DIM)
    assert jnp.allclose(out, ref, atol=1e-4, rtol=1e-4)

    print("KERNEL_OK")
</pallas_src>

<mosaic_0001>
module attributes {stable_mosaic.version = 11 : i64} {
  func.func @_lstm_linear_kernel(%arg0: i32, %arg1: memref<64x26xf32, #tpu.memory_space<vmem>>, %arg2: memref<104x256xf32, #tpu.memory_space<vmem>>, %arg3: memref<72x3xf32, #tpu.memory_space<vmem>>, %arg4: memref<8x3xf32, #tpu.memory_space<vmem>>, %arg5: memref<64x256xf32, #tpu.memory_space<vmem>>) attributes {dimension_semantics = [#tpu.dimension_semantics<arbitrary>], iteration_bounds = array<i64: 1>, scalar_prefetch = 0 : i64, scratch_operands = 1 : i64, tpu.core_type = #tpu.core_type<tc>, window_params = [{pipeline_mode = #tpu.pipeline_mode<synchronous>, transform_indices = @transform_0, window_bounds = array<i64: 64, 26>}, {pipeline_mode = #tpu.pipeline_mode<synchronous>, transform_indices = @transform_1, window_bounds = array<i64: 104, 256>}, {pipeline_mode = #tpu.pipeline_mode<synchronous>, transform_indices = @transform_2, window_bounds = array<i64: 72, 3>}, {pipeline_mode = #tpu.pipeline_mode<synchronous>, transform_indices = @transform_3, window_bounds = array<i64: 8, 3>}]} {
    %c0 = arith.constant 0 : index
    %c0_0 = arith.constant 0 : index
    %0 = vector.load %arg1[%c0, %c0_0] : memref<64x26xf32, #tpu.memory_space<vmem>>, vector<64x26xf32>
    %c0_1 = arith.constant 0 : index
    %c0_2 = arith.constant 0 : index
    %1 = vector.load %arg2[%c0_1, %c0_2] : memref<104x256xf32, #tpu.memory_space<vmem>>, vector<26x256xf32>
    %cst = arith.constant dense<0.000000e+00> : vector<64x256xf32>
    %2 = tpu.matmul %0, %1, %cst {dimension_numbers = #tpu.dot_dimension_numbers<[1], [0], [0], [1], [0, 0, 1, 1], [], []>} : vector<64x26xf32>, vector<26x256xf32>, vector<64x256xf32> -> vector<64x256xf32>
    %c96 = arith.constant 96 : index
    %c0_3 = arith.constant 0 : index
    %3 = vector.load %arg2[%c96, %c0_3] : memref<104x256xf32, #tpu.memory_space<vmem>>, vector<1x256xf32>
    %4 = vector.broadcast %3 : vector<1x256xf32> to vector<64x256xf32>
    %5 = arith.addf %2, %4 : vector<64x256xf32>
    %c0_4 = arith.constant 0 : index
    %c0_5 = arith.constant 0 : index
    %6 = vector.load %arg5[%c0_4, %c0_5] : memref<64x256xf32, #tpu.memory_space<vmem>>, vector<64x256xf32>
    tpu.vector_store %arg5[%c0_4, %c0_5], %5 {strides = array<i32>} : memref<64x256xf32, #tpu.memory_space<vmem>>, vector<64x256xf32>,
    %c32 = arith.constant 32 : index
    %c0_6 = arith.constant 0 : index
    %7 = vector.load %arg2[%c32, %c0_6] : memref<104x256xf32, #tpu.memory_space<vmem>>, vector<64x256xf32>
    %8 = tpu.iota {dimensions = array<i32: 1>} : vector<8x256xi32>
    %c128_i32 = arith.constant 128 : i32
    %9 = vector.broadcast %c128_i32 : i32 to vector<8x256xi32>
    %10 = arith.cmpi sge, %8, %9 : vector<8x256xi32>
    %c192_i32 = arith.constant 192 : i32
    %11 = vector.broadcast %c192_i32 : i32 to vector<8x256xi32>
    %12 = arith.cmpi slt, %8, %11 : vector<8x256xi32>
    %13 = arith.andi %10, %12 : vector<8x256xi1>
    %cst_7 = arith.constant 1.000000e+00 : f32
    %cst_8 = arith.constant 5.000000e-01 : f32
    %14 = vector.broadcast %cst_7 : f32 to vector<8x256xf32>
    %15 = vector.broadcast %cst_8 : f32 to vector<8x256xf32>
    %16 = arith.select %13, %14, %15 : vector<8x256xi1>, vector<8x256xf32>
    %cst_9 = arith.constant 0.000000e+00 : f32
    %cst_10 = arith.constant 5.000000e-01 : f32
    %17 = vector.broadcast %cst_9 : f32 to vector<8x256xf32>
    %18 = vector.broadcast %cst_10 : f32 to vector<8x256xf32>
    %19 = arith.select %13, %17, %18 : vector<8x256xi1>, vector<8x256xf32>
    %cst_11 = arith.constant 0.000000e+00 : f32
    %20 = vector.broadcast %cst_11 : f32 to vector<8x64xf32>
    %cst_12 = arith.constant 0.000000e+00 : f32
    %21 = vector.broadcast %cst_12 : f32 to vector<8x64xf32>
    %c0_i32 = arith.constant 0 : i32
    %c8_i32 = arith.constant 8 : i32
    %22 = arith.muli %c0_i32, %c8_i32 : i32
    %23 = tpu.assume_multiple %22, 8 : i32
    %24 = arith.index_cast %23 : i32 to index
    %c0_13 = arith.constant 0 : index
    %25 = vector.load %arg5[%24, %c0_13] : memref<64x256xf32, #tpu.memory_space<vmem>>, vector<8x256xf32>
    %cst_14 = arith.constant dense<0.000000e+00> : vector<8x256xf32>
    %26 = tpu.matmul %20, %7, %cst_14 {dimension_numbers = #tpu.dot_dimension_numbers<[1], [0], [0], [1], [0, 0, 1, 1], [], []>} : vector<8x64xf32>, vector<64x256xf32>, vector<8x256xf32> -> vector<8x256xf32>
    %27 = arith.addf %25, %26 : vector<8x256xf32>
    %28 = math.tanh %27 : vector<8x256xf32>
    %29 = arith.mulf %28, %16 : vector<8x256xf32>
    %30 = arith.addf %29, %19 : vector<8x256xf32>
    %31 = vector.extract_strided_slice %30 {offsets = [0, 0], sizes = [8, 64], strides = [1, 1]} : vector<8x256xf32> to vector<8x64xf32>
    %32 = vector.extract_strided_slice %30 {offsets = [0, 64], sizes = [8, 64], strides = [1, 1]} : vector<8x256xf32> to vector<8x64xf32>
    %33 = vector.extract_strided_slice %30 {offsets = [0, 128], sizes = [8, 64], strides = [1, 1]} : vector<8x256xf32> to vector<8x64xf32>
    %34 = vector.extract_strided_slice %30 {offsets = [0, 192], sizes = [8, 64], strides = [1, 1]} : vector<8x256xf32> to vector<8x64xf32>
    %35 = arith.mulf %32, %21 : vector<8x64xf32>
    %36 = arith.mulf %31, %33 : vector<8x64xf32>
    %37 = arith.addf %35, %36 : vector<8x64xf32>
    %38 = math.tanh %37 : vector<8x64xf32>
    %39 = arith.mulf %34, %38 : vector<8x64xf32>
    %c1_i32 = arith.constant 1 : i32
    %c8_i32_15 = arith.constant 8 : i32
    %40 = arith.muli %c1_i32, %c8_i32_15 : i32
    %41 = tpu.assume_multiple %40, 8 : i32
    %42 = arith.index_cast %41 : i32 to index
    %c0_16 = arith.constant 0 : index
    %43 = vector.load %arg5[%42, %c0_16] : memref<64x256xf32, #tpu.memory_space<vmem>>, vector<8x256xf32>
    %cst_17 = arith.constant dense<0.000000e+00> : vector<8x256xf32>
    %44 = tpu.matmul %39, %7, %cst_17 {dimension_numbers = #tpu.dot_dimension_numbers<[1], [0], [0], [1], [0, 0, 1, 1], [], []>} : vector<8x64xf32>, vector<64x256xf32>, vector<8x256xf32> -> vector<8x256xf32>
    %45 = arith.addf %43, %44 : vector<8x256xf32>
    %46 = math.tanh %45 : vector<8x256xf32>
    %47 = arith.mulf %46, %16 : vector<8x256xf32>
    %48 = arith.addf %47, %19 : vector<8x256xf32>
    %49 = vector.extract_strided_slice %48 {offsets = [0, 0], sizes = [8, 64], strides = [1, 1]} : vector<8x256xf32> to vector<8x64xf32>
    %50 = vector.extract_strided_slice %48 {offsets = [0, 64], sizes = [8, 64], strides = [1, 1]} : vector<8x256xf32> to vector<8x64xf32>
    %51 = vector.extract_strided_slice %48 {offsets = [0, 128], sizes = [8, 64], strides = [1, 1]} : vector<8x256xf32> to vector<8x64xf32>
    %52 = vector.extract_strided_slice %48 {offsets = [0, 192], sizes = [8, 64], strides = [1, 1]} : vector<8x256xf32> to vector<8x64xf32>
    %53 = arith.mulf %50, %37 : vector<8x64xf32>
    %54 = arith.mulf %49, %51 : vector<8x64xf32>
    %55 = arith.addf %53, %54 : vector<8x64xf32>
    %56 = math.tanh %55 : vector<8x64xf32>
    %57 = arith.mulf %52, %56 : vector<8x64xf32>
    %c2_i32 = arith.constant 2 : i32
    %c8_i32_18 = arith.constant 8 : i32
    %58 = arith.muli %c2_i32, %c8_i32_18 : i32
    %59 = tpu.assume_multiple %58, 8 : i32
    %60 = arith.index_cast %59 : i32 to index
    %c0_19 = arith.constant 0 : index
    %61 = vector.load %arg5[%60, %c0_19] : memref<64x256xf32, #tpu.memory_space<vmem>>, vector<8x256xf32>
    %cst_20 = arith.constant dense<0.000000e+00> : vector<8x256xf32>
    %62 = tpu.matmul %57, %7, %cst_20 {dimension_numbers = #tpu.dot_dimension_numbers<[1], [0], [0], [1], [0, 0, 1, 1], [], []>} : vector<8x64xf32>, vector<64x256xf32>, vector<8x256xf32> -> vector<8x256xf32>
    %63 = arith.addf %61, %62 : vector<8x256xf32>
    %64 = math.tanh %63 : vector<8x256xf32>
    %65 = arith.mulf %64, %16 : vector<8x256xf32>
    %66 = arith.addf %65, %19 : vector<8x256xf32>
    %67 = vector.extract_strided_slice %66 {offsets = [0, 0], sizes = [8, 64], strides = [1, 1]} : vector<8x256xf32> to vector<8x64xf32>
    %68 = vector.extract_strided_slice %66 {offsets = [0, 64], sizes = [8, 64], strides = [1, 1]} : vector<8x256xf32> to vector<8x64xf32>
    %69 = vector.extract_strided_slice %66 {offsets = [0, 128], sizes = [8, 64], strides = [1, 1]} : vector<8x256xf32> to vector<8x64xf32>
    %70 = vector.extract_strided_slice %66 {offsets = [0, 192], sizes = [8, 64], strides = [1, 1]} : vector<8x256xf32> to vector<8x64xf32>
    %71 = arith.mulf %68, %55 : vector<8x64xf32>
    %72 = arith.mulf %67, %69 : vector<8x64xf32>
    %73 = arith.addf %71, %72 : vector<8x64xf32>
    %74 = math.tanh %73 : vector<8x64xf32>
    %75 = arith.mulf %70, %74 : vector<8x64xf32>
    %c3_i32 = arith.constant 3 : i32
    %c8_i32_21 = arith.constant 8 : i32
    %76 = arith.muli %c3_i32, %c8_i32_21 : i32
    %77 = tpu.assume_multiple %76, 8 : i32
    %78 = arith.index_cast %77 : i32 to index
    %c0_22 = arith.constant 0 : index
    %79 = vector.load %arg5[%78, %c0_22] : memref<64x256xf32, #tpu.memory_space<vmem>>, vector<8x256xf32>
    %cst_23 = arith.constant dense<0.000000e+00> : vector<8x256xf32>
    %80 = tpu.matmul %75, %7, %cst_23 {dimension_numbers = #tpu.dot_dimension_numbers<[1], [0], [0], [1], [0, 0, 1, 1], [], []>} : vector<8x64xf32>, vector<64x256xf32>, vector<8x256xf32> -> vector<8x256xf32>
    %81 = arith.addf %79, %80 : vector<8x256xf32>
    %82 = math.tanh %81 : vector<8x256xf32>
    %83 = arith.mulf %82, %16 : vector<8x256xf32>
    %84 = arith.addf %83, %19 : vector<8x256xf32>
    %85 = vector.extract_strided_slice %84 {offsets = [0, 0], sizes = [8, 64], strides = [1, 1]} : vector<8x256xf32> to vector<8x64xf32>
    %86 = vector.extract_strided_slice %84 {offsets = [0, 64], sizes = [8, 64], strides = [1, 1]} : vector<8x256xf32> to vector<8x64xf32>
    %87 = vector.extract_strided_slice %84 {offsets = [0, 128], sizes = [8, 64], strides = [1, 1]} : vector<8x256xf32> to vector<8x64xf32>
    %88 = vector.extract_strided_slice %84 {offsets = [0, 192], sizes = [8, 64], strides = [1, 1]} : vector<8x256xf32> to vector<8x64xf32>
    %89 = arith.mulf %86, %73 : vector<8x64xf32>
    %90 = arith.mulf %85, %87 : vector<8x64xf32>
    %91 = arith.addf %89, %90 : vector<8x64xf32>
    %92 = math.tanh %91 : vector<8x64xf32>
    %93 = arith.mulf %88, %92 : vector<8x64xf32>
    %c4_i32 = arith.constant 4 : i32
    %c8_i32_24 = arith.constant 8 : i32
    %94 = arith.muli %c4_i32, %c8_i32_24 : i32
    %95 = tpu.assume_multiple %94, 8 : i32
    %96 = arith.index_cast %95 : i32 to index
    %c0_25 = arith.constant 0 : index
    %97 = vector.load %arg5[%96, %c0_25] : memref<64x256xf32, #tpu.memory_space<vmem>>, vector<8x256xf32>
    %cst_26 = arith.constant dense<0.000000e+00> : vector<8x256xf32>
    %98 = tpu.matmul %93, %7, %cst_26 {dimension_numbers = #tpu.dot_dimension_numbers<[1], [0], [0], [1], [0, 0, 1, 1], [], []>} : vector<8x64xf32>, vector<64x256xf32>, vector<8x256xf32> -> vector<8x256xf32>
    %99 = arith.addf %97, %98 : vector<8x256xf32>
    %100 = math.tanh %99 : vector<8x256xf32>
    %101 = arith.mulf %100, %16 : vector<8x256xf32>
    %102 = arith.addf %101, %19 : vector<8x256xf32>
    %103 = vector.extract_strided_slice %102 {offsets = [0, 0], sizes = [8, 64], strides = [1, 1]} : vector<8x256xf32> to vector<8x64xf32>
    %104 = vector.extract_strided_slice %102 {offsets = [0, 64], sizes = [8, 64], strides = [1, 1]} : vector<8x256xf32> to vector<8x64xf32>
    %105 = vector.extract_strided_slice %102 {offsets = [0, 128], sizes = [8, 64], strides = [1, 1]} : vector<8x256xf32> to vector<8x64xf32>
    %106 = vector.extract_strided_slice %102 {offsets = [0, 192], sizes = [8, 64], strides = [1, 1]} : vector<8x256xf32> to vector<8x64xf32>
    %107 = arith.mulf %104, %91 : vector<8x64xf32>
    %108 = arith.mulf %103, %105 : vector<8x64xf32>
    %109 = arith.addf %107, %108 : vector<8x64xf32>
    %110 = math.tanh %109 : vector<8x64xf32>
    %111 = arith.mulf %106, %110 : vector<8x64xf32>
    %c5_i32 = arith.constant 5 : i32
    %c8_i32_27 = arith.constant 8 : i32
    %112 = arith.muli %c5_i32, %c8_i32_27 : i32
    %113 = tpu.assume_multiple %112, 8 : i32
    %114 = arith.index_cast %113 : i32 to index
    %c0_28 = arith.constant 0 : index
    %115 = vector.load %arg5[%114, %c0_28] : memref<64x256xf32, #tpu.memory_space<vmem>>, vector<8x256xf32>
    %cst_29 = arith.constant dense<0.000000e+00> : vector<8x256xf32>
    %116 = tpu.matmul %111, %7, %cst_29 {dimension_numbers = #tpu.dot_dimension_numbers<[1], [0], [0], [1], [0, 0, 1, 1], [], []>} : vector<8x64xf32>, vector<64x256xf32>, vector<8x256xf32> -> vector<8x256xf32>
    %117 = arith.addf %115, %116 : vector<8x256xf32>
    %118 = math.tanh %117 : vector<8x256xf32>
    %119 = arith.mulf %118, %16 : vector<8x256xf32>
    %120 = arith.addf %119, %19 : vector<8x256xf32>
    %121 = vector.extract_strided_slice %120 {offsets = [0, 0], sizes = [8, 64], strides = [1, 1]} : vector<8x256xf32> to vector<8x64xf32>
    %122 = vector.extract_strided_slice %120 {offsets = [0, 64], sizes = [8, 64], strides = [1, 1]} : vector<8x256xf32> to vector<8x64xf32>
    %123 = vector.extract_strided_slice %120 {offsets = [0, 128], sizes = [8, 64], strides = [1, 1]} : vector<8x256xf32> to vector<8x64xf32>
    %124 = vector.extract_strided_slice %120 {offsets = [0, 192], sizes = [8, 64], strides = [1, 1]} : vector<8x256xf32> to vector<8x64xf32>
    %125 = arith.mulf %122, %109 : vector<8x64xf32>
    %126 = arith.mulf %121, %123 : vector<8x64xf32>
    %127 = arith.addf %125, %126 : vector<8x64xf32>
    %128 = math.tanh %127 : vector<8x64xf32>
    %129 = arith.mulf %124, %128 : vector<8x64xf32>
    %c6_i32 = arith.constant 6 : i32
    %c8_i32_30 = arith.constant 8 : i32
    %130 = arith.muli %c6_i32, %c8_i32_30 : i32
    %131 = tpu.assume_multiple %130, 8 : i32
    %132 = arith.index_cast %131 : i32 to index
    %c0_31 = arith.constant 0 : index
    %133 = vector.load %arg5[%132, %c0_31] : memref<64x256xf32, #tpu.memory_space<vmem>>, vector<8x256xf32>
    %cst_32 = arith.constant dense<0.000000e+00> : vector<8x256xf32>
    %134 = tpu.matmul %129, %7, %cst_32 {dimension_numbers = #tpu.dot_dimension_numbers<[1], [0], [0], [1], [0, 0, 1, 1], [], []>} : vector<8x64xf32>, vector<64x256xf32>, vector<8x256xf32> -> vector<8x256xf32>
    %135 = arith.addf %133, %134 : vector<8x256xf32>
    %136 = math.tanh %135 : vector<8x256xf32>
    %137 = arith.mulf %136, %16 : vector<8x256xf32>
    %138 = arith.addf %137, %19 : vector<8x256xf32>
    %139 = vector.extract_strided_slice %138 {offsets = [0, 0], sizes = [8, 64], strides = [1, 1]} : vector<8x256xf32> to vector<8x64xf32>
    %140 = vector.extract_strided_slice %138 {offsets = [0, 64], sizes = [8, 64], strides = [1, 1]} : vector<8x256xf32> to vector<8x64xf32>
    %141 = vector.extract_strided_slice %138 {offsets = [0, 128], sizes = [8, 64], strides = [1, 1]} : vector<8x256xf32> to vector<8x64xf32>
    %142 = vector.extract_strided_slice %138 {offsets = [0, 192], sizes = [8, 64], strides = [1, 1]} : vector<8x256xf32> to vector<8x64xf32>
    %143 = arith.mulf %140, %127 : vector<8x64xf32>
    %144 = arith.mulf %139, %141 : vector<8x64xf32>
    %145 = arith.addf %143, %144 : vector<8x64xf32>
    %146 = math.tanh %145 : vector<8x64xf32>
    %147 = arith.mulf %142, %146 : vector<8x64xf32>
    %c7_i32 = arith.constant 7 : i32
    %c8_i32_33 = arith.constant 8 : i32
    %148 = arith.muli %c7_i32, %c8_i32_33 : i32
    %149 = tpu.assume_multiple %148, 8 : i32
    %150 = arith.index_cast %149 : i32 to index
    %c0_34 = arith.constant 0 : index
    %151 = vector.load %arg5[%150, %c0_34] : memref<64x256xf32, #tpu.memory_space<vmem>>, vector<8x256xf32>
    %cst_35 = arith.constant dense<0.000000e+00> : vector<8x256xf32>
    %152 = tpu.matmul %147, %7, %cst_35 {dimension_numbers = #tpu.dot_dimension_numbers<[1], [0], [0], [1], [0, 0, 1, 1], [], []>} : vector<8x64xf32>, vector<64x256xf32>, vector<8x256xf32> -> vector<8x256xf32>
    %153 = arith.addf %151, %152 : vector<8x256xf32>
    %154 = math.tanh %153 : vector<8x256xf32>
    %155 = arith.mulf %154, %16 : vector<8x256xf32>
    %156 = arith.addf %155, %19 : vector<8x256xf32>
    %157 = vector.extract_strided_slice %156 {offsets = [0, 0], sizes = [8, 64], strides = [1, 1]} : vector<8x256xf32> to vector<8x64xf32>
    %158 = vector.extract_strided_slice %156 {offsets = [0, 64], sizes = [8, 64], strides = [1, 1]} : vector<8x256xf32> to vector<8x64xf32>
    %159 = vector.extract_strided_slice %156 {offsets = [0, 128], sizes = [8, 64], strides = [1, 1]} : vector<8x256xf32> to vector<8x64xf32>
    %160 = vector.extract_strided_slice %156 {offsets = [0, 192], sizes = [8, 64], strides = [1, 1]} : vector<8x256xf32> to vector<8x64xf32>
    %161 = arith.mulf %158, %145 : vector<8x64xf32>
    %162 = arith.mulf %157, %159 : vector<8x64xf32>
    %163 = arith.addf %161, %162 : vector<8x64xf32>
    %164 = math.tanh %163 : vector<8x64xf32>
    %165 = arith.mulf %160, %164 : vector<8x64xf32>
    %c8_i32_36 = arith.constant 8 : i32
    %c0_37 = arith.constant 0 : index
    %c0_38 = arith.constant 0 : index
    %166 = vector.load %arg3[%c0_37, %c0_38] : memref<72x3xf32, #tpu.memory_space<vmem>>, vector<64x3xf32>
    %cst_39 = arith.constant dense<0.000000e+00> : vector<8x3xf32>
    %167 = tpu.matmul %165, %166, %cst_39 {dimension_numbers = #tpu.dot_dimension_numbers<[1], [0], [0], [1], [0, 0, 1, 1], [], []>} : vector<8x64xf32>, vector<64x3xf32>, vector<8x3xf32> -> vector<8x3xf32>
    %c64 = arith.constant 64 : index
    %c0_40 = arith.constant 0 : index
    %168 = vector.load %arg3[%c64, %c0_40] : memref<72x3xf32, #tpu.memory_space<vmem>>, vector<1x3xf32>
    %169 = vector.broadcast %168 : vector<1x3xf32> to vector<8x3xf32>
    %170 = arith.addf %167, %169 : vector<8x3xf32>
    %c0_41 = arith.constant 0 : index
    %c0_42 = arith.constant 0 : index
    %171 = vector.load %arg4[%c0_41, %c0_42] : memref<8x3xf32, #tpu.memory_space<vmem>>, vector<8x3xf32>
    tpu.vector_store %arg4[%c0_41, %c0_42], %170 {strides = array<i32>} : memref<8x3xf32, #tpu.memory_space<vmem>>, vector<8x3xf32>,
    return
  }
  func.func @transform_0(%arg0: i32) -> (i32, i32) {
    %c0_i32 = arith.constant 0 : i32
    %c0_i32_0 = arith.constant 0 : i32
    %c0_i32_1 = arith.constant 0 : i32
    return %c0_i32, %c0_i32_0 : i32, i32
  }
  func.func @transform_1(%arg0: i32) -> (i32, i32) {
    %c0_i32 = arith.constant 0 : i32
    %c0_i32_0 = arith.constant 0 : i32
    %c0_i32_1 = arith.constant 0 : i32
    return %c0_i32, %c0_i32_0 : i32, i32
  }
  func.func @transform_2(%arg0: i32) -> (i32, i32) {
    %c0_i32 = arith.constant 0 : i32
    %c0_i32_0 = arith.constant 0 : i32
    %c0_i32_1 = arith.constant 0 : i32
    return %c0_i32, %c0_i32_0 : i32, i32
  }
  func.func @transform_3(%arg0: i32) -> (i32, i32) {
    %c0_i32 = arith.constant 0 : i32
    %c0_i32_0 = arith.constant 0 : i32
    %c0_i32_1 = arith.constant 0 : i32
    return %c0_i32, %c0_i32_0 : i32, i32
  }
}

</mosaic_0001>

<bundles_post_ra>
// kernel: tpu_custom_call.1
= control target key start
LH: loop header
LB: loop body
LE: loop exit
PB: predicated region body
PF: predicated region fallthrough
CT: control target
= control target key end

     0   :  { %8 = vsyncpa [#allocation4], 0  ;;  %s1442_s12 = smov [#allocation3]   ;;  %s1745_s0 = inlined_call_operand.vmem [shape: f32[64,26], index: 0, kind: input, shape index: {}]   ;;  %s1746_s1 = inlined_call_operand.hbm [shape: f32[104,256], index: 1, kind: input, shape index: {}]   ;;  %s1747_s2 = inlined_call_operand.vmem [shape: f32[72,3], index: 2, kind: input, shape index: {}]   ;;  %s1748_s3 = inlined_call_operand.vmem [shape: f32[8,3], index: 3, kind: output, shape index: {}]  }
   0x1   :  { %s16_s13 = sshll.u32 %s1442_s12, 4  ;;  %s1418_s16 = scalar_lea.hbm %s1746_s1, 3328  ;;  %s17_s13 = int_to_ptr.vmem [resolvable:$true] %s16_s13 }
   0x2   :  { %p1419_p0 = scmp.ne.s32.totalorder %s1746_s1, %s1418_s16  ;;  %p1422_p1 = scmp.lt.u32.totalorder %s1418_s16, %s1746_s1 }
   0x4   :  { %p1424_p2 = pnand %p1422_p1, %p1419_p0 }
   0x6   :  { %1427 = shalt.err (!%p1424_p2)
}
   0x7   :  { %s1428_s21 = scalar_lea.vmem %s17_s13, 3328  ;;  %p1433_p4 = scmp.lt.s32.totalorder %s17_s13, %s17_s13 }
   0x8   :  { %p1429_p3 = scmp.ne.s32.totalorder %s17_s13, %s1428_s21  ;;  %p1434_p5 = scmp.lt.s32.totalorder %s1428_s21, %s1428_s21 }
   0xa   :  { %p1435_p6 = por %p1434_p5, %p1433_p4 }
   0xc   :  { %p1436_p7 = pnand %p1435_p6, %p1429_p3 }
   0xe   :  { %1439 = shalt.err (!%p1436_p7)
}
   0xf   :  { %s1443_s22 = smov 256   ;;  %s1444_s23 = smov 16  }
  0x10   :  { %22 = dma.hbm_to_vmem [thread:$0]  %s1746_s1, 3328, %s17_s13, [#allocation4], %s1443_s22, %s1443_s22, %s1444_s23  }
  0x11   :  { %1440 = dma.done.wait [#allocation4], 3328  }
  0x12   :  { %1441 = vsyncadd [#allocation4], 4294963968  ;;  %v1445_v0 = vmov 0.0   ;;  %vm82_vm0 = vcmask 1041408   ;;  %v37_v1 = vld [vmem:[#allocation3 + $0x8] sm:$0xff]  ;;  %v39_v2 = vld [vmem:[#allocation3 + $0x18] sm:$0xff]  ;;  %v47_v50 = vlaneseq }
  0x13   :  { %153 = vmatprep.mubr.f32.mxu1 %v1445_v0  ;;  %614 = vmatprep.mubr.f32.mxu0 %v1445_v0  ;;  %v36_v3 = vld [vmem:[#allocation3] sm:$0xff]  ;;  %v1179_v4 = vpack.c.bf16 %v39_v2, %v37_v1  ;;  %v38_v5 = vld [vmem:[#allocation3 + $0x10] sm:$0xff]  ;;  %v41_v6 = vld [vmem:[#allocation3 + $0x28] sm:$0xff]  ;;  %vm1446_vm1 = vmmov 1   ;;  %vm57_vm3 = vcmask 211968   ;;  %vm252_vm5 = vcmask 523264  }
  0x14   :  { %v43_v7 = vld [vmem:[#allocation3 + $0x38] sm:$0x3]  ;;  %v1181_v8 = vpack.c.bf16 %v38_v5, %v36_v3  ;;  %vm1485_vm2 = vmpackc.low %vm82_vm0, %vm1446_vm1  ;;  %v40_v11 = vld [vmem:[#allocation3 + $0x20] sm:$0xff]  ;;  %v48_v53 = vshrl.u32 %v47_v50, 7  ;;  %v235_v3 = vand.u32 127, %v47_v50  ;;  %vm1450_vm6 = vmmov 0  }
  0x15   :  { %v1183_v9 = vpack.c.bf16 %v43_v7, %v41_v6  ;;  %v42_v12 = vld [vmem:[#allocation3 + $0x30] sm:$0x3]  ;;  %1180 = vmatprep.subr.bf16.mxu1 %v1179_v4  ;;  %v219_v13 = vld [vmem:[#allocation3 + $0x48] sm:$0xff]  ;;  %v221_v14 = vld [vmem:[#allocation3 + $0x58] sm:$0xff]  ;;  %v1447_v6 = vmov 0.5   ;;  %vm1118_vm7 = vcmask 23552  }
  0x16   :  { %v218_v15 = vld [vmem:[#allocation3 + $0x40] sm:$0xff]  ;;  %1182 = vmatpush1.bf16.msra.mxu1 %v1181_v8  ;;  %v1186_v16 = vpack.c.bf16 %v42_v12, %v40_v11  ;;  %v1489_v17 = vpack.c.bf16 %v221_v14, %v219_v13  ;;  %v220_v18 = vld [vmem:[#allocation3 + $0x50] sm:$0xff]  ;;  %v223_v20 = vld [vmem:[#allocation3 + $0x68] sm:$0xff]  ;;  %v49_v56 = vsub.s32 0, %v48_v53  ;;  %v53_v58 = vsub.s32 1, %v48_v53 }
  0x17   :  { %1185 = vmatprep.subr.msk.bf16.mxu1 %vm1485_vm2, %v1183_v9  ;;  %v1493_v19 = vpack.c.bf16 %v220_v18, %v218_v15  ;;  %v225_v21 = vld [vmem:[#allocation3 + $0x78] sm:$0xff]  ;;  %v222_v23 = vld [vmem:[#allocation3 + $0x60] sm:$0xff]  ;;  %v224_v24 = vld [vmem:[#allocation3 + $0x70] sm:$0xff]  ;;  %v236_v5 = vadd.s32 128, %v235_v3 }
  0x18   :  { %v1495_v22 = vpack.c.bf16 %v225_v21, %v223_v20  ;;  %1238 = vmatprep.subr.bf16.mxu0 %v1489_v17  ;;  %v28_v25 = vld [vmem:[%s1745_s0] sm:$0xff]  ;;  %v227_v26 = vld [vmem:[#allocation3 + $0x88] sm:$0xff]  ;;  %v229_v27 = vld [vmem:[#allocation3 + $0x98] sm:$0xff]  ;;  %v1506_v28 = vpack.c.bf16 %v224_v24, %v222_v23 }
  0x19   :  { %1240 = vmatpush1.bf16.msra.mxu0 %v1493_v19  ;;  %v226_v29 = vld [vmem:[#allocation3 + $0x80] sm:$0xff]  ;;  %v228_v30 = vld [vmem:[#allocation3 + $0x90] sm:$0xff]  ;;  %v1509_v31 = vpack.c.bf16 %v229_v27, %v227_v26  ;;  %v29_v32 = vld [vmem:[%s1745_s0 + $0x8] sm:$0xff]  ;;  %vm240_vm4 = vcmp.lt.s32.totalorder %v236_v5, 192 }
  0x1a   :  { %1188 = vmatpush1.bf16.msk.msra.mxu1 %vm1485_vm2, %v1186_v16  ;;  %1242 = vmatprep.subr.bf16.mxu0 %v1495_v22  ;;  %v231_v33 = vld [vmem:[#allocation3 + $0xa8] sm:$0xff]  ;;  %v233_v34 = vld [vmem:[#allocation3 + $0xb8] sm:$0xff]  ;;  %v1518_v35 = vpack.c.bf16 %v228_v30, %v226_v29  ;;  %v230_v36 = vld [vmem:[#allocation3 + $0xa0] sm:$0xff]  ;;  %v1603_v7 = vsel %vm240_vm4, 1.0, %v1447_v6  ;;  %v1605_v11 = vsel %vm240_vm4, 0.0, %v1447_v6 }
  0x1b   :  { %1190 = vmatprep.subr.bf16.mxu1 %v1489_v17  ;;  %v232_v37 = vld [vmem:[#allocation3 + $0xb0] sm:$0xff]  ;;  %v1522_v38 = vpack.c.bf16 %v233_v34, %v231_v33  ;;  %v31_v41 = vld [vmem:[%s1745_s0 + $0x18] sm:$0xff]  ;;  %v32_v42 = vld [vmem:[%s1745_s0 + $0x20] sm:$0xff] }
  0x1c   :  { %v30_v39 = vld [vmem:[%s1745_s0 + $0x10] sm:$0xff]  ;;  %v1531_v40 = vpack.c.bf16 %v232_v37, %v230_v36  ;;  %v33_v43 = vld [vmem:[%s1745_s0 + $0x28] sm:$0xff]  ;;  %v35_v45 = vld [vmem:[%s1745_s0 + $0x38] sm:$0xff] }
  0x1d   :  { %1134 = vmatmul.mubr.msk.f32.vlgmr.msra.gmra.mrb[0].mxu1 %vm57_vm3, %v28_v25  ;;  %1244 = vmatpush1.bf16.msra.mxu0 %v1506_v28  ;;  %v34_v44 = vld [vmem:[%s1745_s0 + $0x30] sm:$0xff]  ;;  %v45_v57 = vld [vmem:[#allocation3 + $0xc0] ss:$8 sm:$0x3]  ;;  %s1448_s0 = smov 64  }
  0x1e   :  { %1192 = vmatpush1.bf16.msra.mxu1 %v1493_v19  ;;  %159 = vmatprep.mubr.f32.mxu1 %v1445_v0  ;;  %v1597_v61 = vrot.slane %v45_v57, %v49_v56  ;;  %v1599_v62 = vrot.slane %v45_v57, %v53_v58 }
  0x1f   :  { %1194 = vmatprep.subr.bf16.mxu1 %v1495_v22  ;;  %1246 = vmatprep.subr.bf16.mxu0 %v1509_v31 }
  0x21   :  { %1135 = vmatmul.mubr.msk.f32.gmra.mrb[2].mxu1 %vm57_vm3, %v29_v32  ;;  %1248 = vmatpush1.bf16.msra.mxu0 %v1518_v35 }
  0x22   :  { %165 = vmatprep.mubr.f32.mxu1 %v1445_v0  ;;  %1196 = vmatpush1.bf16.msra.mxu1 %v1506_v28 }
  0x23   :  { %1198 = vmatprep.subr.bf16.mxu1 %v1509_v31  ;;  %1250 = vmatprep.subr.bf16.mxu0 %v1522_v38 }
  0x25   :  { %1136 = vmatmul.mubr.msk.f32.gmra.mrb[4].mxu1 %vm57_vm3, %v30_v39  ;;  %1252 = vmatpush1.bf16.msra.mxu0 %v1531_v40 }
  0x26   :  { %171 = vmatprep.mubr.f32.mxu1 %v1445_v0  ;;  %1200 = vmatpush1.bf16.msra.mxu1 %v1518_v35 }
  0x27   :  { %1202 = vmatprep.subr.bf16.mxu1 %v1522_v38  ;;  %1254 = vmatprep.subr.bf16.mxu0 %v1489_v17 }
  0x29   :  { %1137 = vmatmul.mubr.msk.f32.gmra.mrb[6].mxu1 %vm57_vm3, %v31_v41 }
  0x2a   :  { %177 = vmatprep.mubr.f32.mxu1 %v1445_v0  ;;  %1204 = vmatpush1.bf16.msra.mxu1 %v1531_v40 }
  0x2b   :  { %1206 = vmatprep.subr.bf16.mxu1 %v1489_v17 }
  0x2d   :  { %1138 = vmatmul.mubr.msk.f32.gmra.mrb[8].mxu1 %vm57_vm3, %v32_v42 }
  0x2e   :  { %183 = vmatprep.mubr.f32.mxu1 %v1445_v0 }
  0x31   :  { %1139 = vmatmul.mubr.msk.f32.gmra.mrb[10].mxu1 %vm57_vm3, %v33_v43 }
  0x32   :  { %189 = vmatprep.mubr.f32.mxu1 %v1445_v0 }
  0x35   :  { %1140 = vmatmul.mubr.msk.f32.gmra.mrb[12].mxu1 %vm57_vm3, %v34_v44 }
  0x36   :  { %195 = vmatprep.mubr.f32.mxu1 %v1445_v0 }
  0x39   :  { %1141 = vmatmul.mubr.msk.f32.gmra.mrb[14].mxu1 %vm57_vm3, %v35_v45 }
  0x3a   :  { %320 = vmatprep.mubr.f32.mxu1 %v1445_v0 }
  0x3d   :  { %321 = vmatmul.mubr.f32.vlgmr.msra.gmra.mrb[0].mxu1 %v1445_v0 }
  0x3e   :  { %1208 = vmatpush1.bf16.msra.mxu1 %v1493_v19  ;;  %418 = vmatprep.mubr.f32.mxu1 %v1445_v0 }
  0x3f   :  { %1210 = vmatprep.subr.bf16.mxu1 %v1495_v22 }
  0x42   :  { %1212 = vmatpush1.bf16.msra.mxu1 %v1506_v28 }
  0x43   :  { %1214 = vmatprep.subr.bf16.mxu1 %v1509_v31 }
  0x46   :  { %1216 = vmatpush1.bf16.msra.mxu1 %v1518_v35 }
  0x47   :  { %1218 = vmatprep.subr.bf16.mxu1 %v1522_v38 }
  0x4a   :  { %1220 = vmatpush1.bf16.msra.mxu1 %v1531_v40 }
  0x4b   :  { %1222 = vmatprep.subr.bf16.mxu1 %v1489_v17 }
  0xfc   :  { %v1577_v46 = vpop.f32.mrb[6].mxu1 }
  0xfd   :  { %v1579_v47 = vpop.f32.mrb[7].mxu1 }
 0x100   :  { %v1581_v48 = vpop.f32.mrb[8].mxu1 }
 0x101   :  { %v1583_v49 = vpop.f32.mrb[9].mxu1 }
 0x104   :  { %v1585_v51 = vpop.f32.mrb[10].mxu1 }
 0x105   :  { %v1587_v52 = vpop.f32.mrb[11].mxu1 }
 0x108   :  { %v1589_v54 = vpop.f32.mrb[12].mxu1 }
 0x109   :  { %v1591_v55 = vpop.f32.mrb[13].mxu1 }
 0x10c   :  { %v1593_v59 = vpop.f32.mrb[14].mxu1 }
 0x10d   :  { %v1595_v60 = vpop.f32.mrb[15].mxu1 }
 0x110   :  { %v322_v63 = vpop.f32.mrb[0].mxu1 }
 0x111   :  { %v1329_v1 = vadd.f32 %v322_v63, %v1597_v61  ;;  %v324_v2 = vpop.f32.mrb[1].mxu1 }
 0x112   :  { %v1330_v4 = vadd.f32 %v324_v2, %v1599_v62 }
 0x113   :  { %1370 = vtanh.f32 %v1329_v1 }
 0x114   :  { %1372 = vtanh.f32 %v1330_v4 }
 0x11d   :  { %v1371_v8 = vpop.eup %1370 }
 0x11e   :  { %v1373_v9 = vpop.eup %1372  ;;  %v331_v10 = vmul.f32 0.5, %v1371_v8 }
 0x11f   :  { %v332_v12 = vmul.f32 %v1373_v9, %v1603_v7 }
 0x120   :  { %v333_v13 = vadd.f32 0.5, %v331_v10 }
 0x121   :  { %v334_v14 = vadd.f32 %v332_v12, %v1605_v11 }
 0x122   :  { %v335_v16 = vmul.f32 0.0, %v333_v13 }
 0x123   :  { %v336_v15 = vmul.f32 %v334_v14, %v333_v13 }
 0x125   :  { %338 = vrot.lane.b32.xlu0 %v336_v15, %s1448_s0  ;;  %v174_v15 = vadd.f32 %v1577_v46, %v1597_v61 }
 0x197   :  { %v339_v18 = vpop.permute.xlu0 %338 }
 0x198   :  { %v341_v20 = vadd.f32 %v339_v18, %v335_v16  ;;  %v176_v16 = vadd.f32 %v1579_v47, %v1599_v62 }
 0x19a   :  { %1374 = vtanh.f32 %v341_v20 }
 0x1a4   :  { %v1375_v21 = vpop.eup %1374 }
 0x1a5   :  { %v343_v23 = vmul.f32 %v1375_v21, %v334_v14 }
 0x1a7   :  { %350 = vrot.lane.b32.xlu0 %v343_v23, %s1448_s0 }
 0x219   :  { %v351_v24 = vpop.permute.xlu0 %350 }
 0x21a   :  { %1142 = vmatmul.mubr.msk.f32.vlgmr.msra.gmra.mrb[2].mxu1 %vm252_vm5, %v351_v24 }
 0x21b   :  { %1224 = vmatpush1.bf16.msra.mxu1 %v1493_v19  ;;  %516 = vmatprep.mubr.f32.mxu1 %v1445_v0 }
 0x21c   :  { %1226 = vmatprep.subr.bf16.mxu1 %v1495_v22 }
 0x21f   :  { %1228 = vmatpush1.bf16.msra.mxu1 %v1506_v28 }
 0x220   :  { %1230 = vmatprep.subr.bf16.mxu1 %v1509_v31 }
 0x223   :  { %1232 = vmatpush1.bf16.msra.mxu1 %v1518_v35 }
 0x224   :  { %1234 = vmatprep.subr.bf16.mxu1 %v1522_v38 }
 0x227   :  { %1236 = vmatpush1.bf16.msra.mxu1 %v1531_v40 }
 0x2ed   :  { %v420_v25 = vpop.f32.mrb[2].mxu1 }
 0x2ee   :  { %v1331_v26 = vadd.f32 %v420_v25, %v1597_v61  ;;  %v422_v27 = vpop.f32.mrb[3].mxu1 }
 0x2ef   :  { %v1332_v29 = vadd.f32 %v422_v27, %v1599_v62 }
 0x2f0   :  { %1376 = vtanh.f32 %v1331_v26 }
 0x2f1   :  { %1378 = vtanh.f32 %v1332_v29 }
 0x2fa   :  { %v1377_v30 = vpop.eup %1376 }
 0x2fb   :  { %v1379_v32 = vpop.eup %1378  ;;  %v429_v33 = vmul.f32 0.5, %v1377_v30 }
 0x2fc   :  { %v430_v34 = vmul.f32 %v1379_v32, %v1603_v7 }
 0x2fd   :  { %v431_v36 = vadd.f32 0.5, %v429_v33 }
 0x2fe   :  { %v432_v37 = vadd.f32 %v430_v34, %v1605_v11 }
 0x2ff   :  { %v433_v41 = vmul.f32 %v431_v36, %v341_v20 }
 0x300   :  { %v434_v39 = vmul.f32 %v432_v37, %v431_v36 }
 0x302   :  { %436 = vrot.lane.b32.xlu1 %v434_v39, %s1448_s0  ;;  %v180_v39 = vadd.f32 %v1581_v48, %v1597_v61 }
 0x374   :  { %v437_v42 = vpop.permute.xlu1 %436 }
 0x375   :  { %v439_v43 = vadd.f32 %v437_v42, %v433_v41  ;;  %v182_v41 = vadd.f32 %v1583_v49, %v1599_v62 }
 0x377   :  { %1380 = vtanh.f32 %v439_v43 }
 0x381   :  { %v1381_v44 = vpop.eup %1380 }
 0x382   :  { %v441_v45 = vmul.f32 %v1381_v44, %v432_v37 }
 0x384   :  { %448 = vrot.lane.b32.xlu1 %v441_v45, %s1448_s0 }
 0x3f6   :  { %v449_v50 = vpop.permute.xlu1 %448 }
 0x3f7   :  { %1143 = vmatmul.mubr.msk.f32.vlgmr.msra.gmra.mrb[4].mxu1 %vm252_vm5, %v449_v50 }
 0x3f8   :  { %1176 = vmatprep.mubr.msk.f32.mxu1 %vm1450_vm6, %v1445_v0 }
 0x4ca   :  { %v518_v53 = vpop.f32.mrb[4].mxu1 }
 0x4cb   :  { %v1333_v56 = vadd.f32 %v518_v53, %v1597_v61  ;;  %v520_v57 = vpop.f32.mrb[5].mxu1 }
 0x4cc   :  { %v1334_v58 = vadd.f32 %v520_v57, %v1599_v62 }
 0x4cd   :  { %1382 = vtanh.f32 %v1333_v56 }
 0x4ce   :  { %1384 = vtanh.f32 %v1334_v58 }
 0x4d7   :  { %v1383_v63 = vpop.eup %1382 }
 0x4d8   :  { %v1385_v1 = vpop.eup %1384  ;;  %v527_v2 = vmul.f32 0.5, %v1383_v63 }
 0x4d9   :  { %v528_v3 = vmul.f32 %v1385_v1, %v1603_v7 }
 0x4da   :  { %v529_v4 = vadd.f32 0.5, %v527_v2 }
 0x4db   :  { %v530_v5 = vadd.f32 %v528_v3, %v1605_v11 }
 0x4dc   :  { %v531_v8 = vmul.f32 %v529_v4, %v439_v43 }
 0x4dd   :  { %v532_v6 = vmul.f32 %v530_v5, %v529_v4 }
 0x4df   :  { %534 = vrot.lane.b32.xlu0 %v532_v6, %s1448_s0  ;;  %v186_v6 = vadd.f32 %v1585_v51, %v1597_v61 }
 0x551   :  { %v535_v9 = vpop.permute.xlu0 %534 }
 0x552   :  { %v537_v10 = vadd.f32 %v535_v9, %v531_v8  ;;  %v188_v8 = vadd.f32 %v1587_v52, %v1599_v62 }
 0x554   :  { %1386 = vtanh.f32 %v537_v10 }
 0x55e   :  { %v1387_v12 = vpop.eup %1386 }
 0x55f   :  { %v539_v13 = vmul.f32 %v1387_v12, %v530_v5 }
 0x561   :  { %546 = vrot.lane.b32.xlu1 %v539_v13, %s1448_s0 }
 0x5d3   :  { %v547_v14 = vpop.permute.xlu1 %546 }
 0x5d4   :  { %1144 = vmatmul.mubr.msk.f32.vlgmr.msra.gmra.mrb[0].mxu0 %vm252_vm5, %v547_v14 }
 0x5d5   :  { %1256 = vmatpush1.bf16.msra.mxu0 %v1493_v19  ;;  %712 = vmatprep.mubr.f32.mxu0 %v1445_v0 }
 0x5d6   :  { %1258 = vmatprep.subr.bf16.mxu0 %v1495_v22 }
 0x5d9   :  { %1260 = vmatpush1.bf16.msra.mxu0 %v1506_v28 }
 0x5da   :  { %1262 = vmatprep.subr.bf16.mxu0 %v1509_v31 }
 0x5dd   :  { %1264 = vmatpush1.bf16.msra.mxu0 %v1518_v35 }
 0x5de   :  { %1266 = vmatprep.subr.bf16.mxu0 %v1522_v38 }
 0x5e1   :  { %1268 = vmatpush1.bf16.msra.mxu0 %v1531_v40 }
 0x5e2   :  { %1270 = vmatprep.subr.bf16.mxu0 %v1489_v17 }
 0x6a7   :  { %v616_v18 = vpop.f32.mrb[0].mxu0 }
 0x6a8   :  { %v621_v20 = vadd.f32 %v616_v18, %v174_v15  ;;  %v618_v21 = vpop.f32.mrb[1].mxu0 }
 0x6a9   :  { %v622_v23 = vadd.f32 %v618_v21, %v176_v16 }
 0x6aa   :  { %1388 = vtanh.f32 %v621_v20 }
 0x6ab   :  { %1390 = vtanh.f32 %v622_v23 }
 0x6b4   :  { %v1389_v24 = vpop.eup %1388 }
 0x6b5   :  { %v1391_v25 = vpop.eup %1390  ;;  %v625_v26 = vmul.f32 0.5, %v1389_v24 }
 0x6b6   :  { %v626_v27 = vmul.f32 %v1391_v25, %v1603_v7 }
 0x6b7   :  { %v627_v29 = vadd.f32 0.5, %v625_v26 }
 0x6b8   :  { %v628_v30 = vadd.f32 %v626_v27, %v1605_v11  ;;  %v192_v27 = vadd.f32 %v1589_v54, %v1597_v61 }
 0x6b9   :  { %v629_v46 = vmul.f32 %v627_v29, %v537_v10 }
 0x6ba   :  { %v630_v32 = vmul.f32 %v628_v30, %v627_v29 }
 0x6bc   :  { %632 = vrot.lane.b32.xlu0 %v630_v32, %s1448_s0 }
 0x72e   :  { %v633_v33 = vpop.permute.xlu0 %632 }
 0x72f   :  { %v635_v47 = vadd.f32 %v633_v33, %v629_v46 }
 0x731   :  { %1392 = vtanh.f32 %v635_v47 }
 0x73b   :  { %v1393_v34 = vpop.eup %1392 }
 0x73c   :  { %v637_v36 = vmul.f32 %v1393_v34, %v628_v30 }
 0x73e   :  { %644 = vrot.lane.b32.xlu1 %v637_v36, %s1448_s0 }
 0x7b0   :  { %v645_v37 = vpop.permute.xlu1 %644 }
 0x7b1   :  { %1145 = vmatmul.mubr.msk.f32.vlgmr.msra.gmra.mrb[2].mxu0 %vm252_vm5, %v645_v37 }
 0x7b2   :  { %1272 = vmatpush1.bf16.msra.mxu0 %v1493_v19  ;;  %810 = vmatprep.mubr.f32.mxu0 %v1445_v0 }
 0x7b3   :  { %1274 = vmatprep.subr.bf16.mxu0 %v1495_v22 }
 0x7b6   :  { %1276 = vmatpush1.bf16.msra.mxu0 %v1506_v28 }
 0x7b7   :  { %1278 = vmatprep.subr.bf16.mxu0 %v1509_v31 }
 0x7ba   :  { %1280 = vmatpush1.bf16.msra.mxu0 %v1518_v35 }
 0x7bb   :  { %1282 = vmatprep.subr.bf16.mxu0 %v1522_v38 }
 0x7be   :  { %1284 = vmatpush1.bf16.msra.mxu0 %v1531_v40 }
 0x7bf   :  { %1286 = vmatprep.subr.bf16.mxu0 %v1489_v17 }
 0x884   :  { %v714_v42 = vpop.f32.mrb[2].mxu0 }
 0x885   :  { %v719_v43 = vadd.f32 %v714_v42, %v180_v39  ;;  %v716_v44 = vpop.f32.mrb[3].mxu0  ;;  %v198_v39 = vadd.f32 %v1593_v59, %v1597_v61  ;;  %v1030_v59 = vld [vmem:[%s1747_s2] sm:$0xff]  ;;  %v1032_v61 = vld [vmem:[%s1747_s2 + $0x10] sm:$0xff] }
 0x886   :  { %v720_v45 = vadd.f32 %v716_v44, %v182_v41  ;;  %v200_v41 = vadd.f32 %v1595_v60, %v1599_v62  ;;  %v1031_v60 = vld [vmem:[%s1747_s2 + $0x8] sm:$0xff] }
 0x887   :  { %1394 = vtanh.f32 %v719_v43 }
 0x888   :  { %1396 = vtanh.f32 %v720_v45 }
 0x891   :  { %v1395_v50 = vpop.eup %1394 }
 0x892   :  { %v1397_v53 = vpop.eup %1396  ;;  %v723_v56 = vmul.f32 0.5, %v1395_v50 }
 0x893   :  { %v724_v57 = vmul.f32 %v1397_v53, %v1603_v7 }
 0x894   :  { %v725_v58 = vadd.f32 0.5, %v723_v56 }
 0x895   :  { %v726_v63 = vadd.f32 %v724_v57, %v1605_v11 }
 0x896   :  { %v727_v48 = vmul.f32 %v725_v58, %v635_v47 }
 0x897   :  { %v728_v1 = vmul.f32 %v726_v63, %v725_v58 }
 0x899   :  { %730 = vrot.lane.b32.xlu0 %v728_v1, %s1448_s0 }
 0x90b   :  { %v731_v2 = vpop.permute.xlu0 %730 }
 0x90c   :  { %v733_v49 = vadd.f32 %v731_v2, %v727_v48  ;;  %v1034_v2 = vld [vmem:[%s1747_s2 + $0x20] sm:$0xff] }
 0x90e   :  { %1398 = vtanh.f32 %v733_v49 }
 0x918   :  { %v1399_v3 = vpop.eup %1398 }
 0x919   :  { %v735_v4 = vmul.f32 %v1399_v3, %v726_v63 }
 0x91b   :  { %742 = vrot.lane.b32.xlu1 %v735_v4, %s1448_s0  ;;  %v1036_v4 = vld [vmem:[%s1747_s2 + $0x30] sm:$0xff] }
 0x98d   :  { %v743_v5 = vpop.permute.xlu1 %742 }
 0x98e   :  { %1146 = vmatmul.mubr.msk.f32.vlgmr.msra.gmra.mrb[4].mxu0 %vm252_vm5, %v743_v5 }
 0x98f   :  { %1288 = vmatpush1.bf16.msra.mxu0 %v1493_v19  ;;  %908 = vmatprep.mubr.f32.mxu0 %v1445_v0 }
 0x990   :  { %1290 = vmatprep.subr.bf16.mxu0 %v1495_v22 }
 0x993   :  { %1292 = vmatpush1.bf16.msra.mxu0 %v1506_v28 }
 0x994   :  { %1294 = vmatprep.subr.bf16.mxu0 %v1509_v31 }
 0x997   :  { %1296 = vmatpush1.bf16.msra.mxu0 %v1518_v35 }
 0x998   :  { %1298 = vmatprep.subr.bf16.mxu0 %v1522_v38 }
 0x99b   :  { %1300 = vmatpush1.bf16.msra.mxu0 %v1531_v40 }
 0x99c   :  { %1302 = vmatprep.subr.bf16.mxu0 %v1489_v17 }
 0xa61   :  { %v812_v9 = vpop.f32.mrb[4].mxu0 }
 0xa62   :  { %v817_v10 = vadd.f32 %v812_v9, %v186_v6  ;;  %v814_v12 = vpop.f32.mrb[5].mxu0 }
 0xa63   :  { %v818_v13 = vadd.f32 %v814_v12, %v188_v8 }
 0xa64   :  { %1400 = vtanh.f32 %v817_v10 }
 0xa65   :  { %1402 = vtanh.f32 %v818_v13 }
 0xa6e   :  { %v1401_v14 = vpop.eup %1400 }
 0xa6f   :  { %v1403_v15 = vpop.eup %1402  ;;  %v821_v16 = vmul.f32 0.5, %v1401_v14  ;;  %v1149_v14 = vld [vmem:[%s1747_s2 + $0x40] ss:$0 sm:$0xff] }
 0xa70   :  { %v822_v18 = vmul.f32 %v1403_v15, %v1603_v7 }
 0xa71   :  { %v823_v20 = vadd.f32 0.5, %v821_v16 }
 0xa72   :  { %v824_v17 = vadd.f32 %v822_v18, %v1605_v11 }
 0xa73   :  { %v825_v51 = vmul.f32 %v823_v20, %v733_v49  ;;  %v1035_v49 = vld [vmem:[%s1747_s2 + $0x28] sm:$0xff] }
 0xa74   :  { %v826_v21 = vmul.f32 %v824_v17, %v823_v20  ;;  %v1324_v3 = vpack.c.bf16 %v1035_v49, %v1034_v2 }
 0xa76   :  { %828 = vrot.lane.b32.xlu0 %v826_v21, %s1448_s0 }
 0xae8   :  { %v829_v23 = vpop.permute.xlu0 %828 }
 0xae9   :  { %v831_v52 = vadd.f32 %v829_v23, %v825_v51 }
 0xaeb   :  { %1404 = vtanh.f32 %v831_v52 }
 0xaf5   :  { %v1405_v24 = vpop.eup %1404 }
 0xaf6   :  { %v833_v25 = vmul.f32 %v1405_v24, %v824_v17 }
 0xaf8   :  { %840 = vrot.lane.b32.xlu1 %v833_v25, %s1448_s0 }
 0xb6a   :  { %v841_v26 = vpop.permute.xlu1 %840 }
 0xb6b   :  { %1147 = vmatmul.mubr.msk.f32.vlgmr.msra.gmra.mrb[6].mxu0 %vm252_vm5, %v841_v26 }
 0xb6c   :  { %1304 = vmatpush1.bf16.msra.mxu0 %v1493_v19  ;;  %1006 = vmatprep.mubr.f32.mxu0 %v1445_v0  ;;  %v194_v19 = vadd.f32 %v1591_v55, %v1599_v62  ;;  %v1449_v62 = vmov 0.0|0.0   ;;  %v1037_v0 = vld [vmem:[%s1747_s2 + $0x38] sm:$0xff] }
 0xb6d   :  { %1306 = vmatprep.subr.bf16.mxu0 %v1495_v22  ;;  %1317 = vmatprep.subr.bf16.mxu1 %v1449_v62  ;;  %v1327_v5 = vpack.c.bf16 %v1037_v0, %v1036_v4 }
 0xb70   :  { %1308 = vmatpush1.bf16.msra.mxu0 %v1506_v28 }
 0xb71   :  { %1310 = vmatprep.subr.bf16.mxu0 %v1509_v31 }
 0xb74   :  { %1312 = vmatpush1.bf16.msra.mxu0 %v1518_v35 }
 0xb75   :  { %1314 = vmatprep.subr.bf16.mxu0 %v1522_v38 }
 0xb78   :  { %1316 = vmatpush1.bf16.msra.mxu0 %v1531_v40 }
 0xc3e   :  { %v910_v29 = vpop.f32.mrb[6].mxu0 }
 0xc3f   :  { %v915_v30 = vadd.f32 %v910_v29, %v192_v27  ;;  %v912_v32 = vpop.f32.mrb[7].mxu0 }
 0xc40   :  { %v916_v22 = vadd.f32 %v912_v32, %v194_v19 }
 0xc41   :  { %1406 = vtanh.f32 %v915_v30 }
 0xc42   :  { %1408 = vtanh.f32 %v916_v22 }
 0xc4b   :  { %v1407_v28 = vpop.eup %1406 }
 0xc4c   :  { %v1409_v31 = vpop.eup %1408  ;;  %v919_v46 = vmul.f32 0.5, %v1407_v28 }
 0xc4d   :  { %v920_v35 = vmul.f32 %v1409_v31, %v1603_v7 }
 0xc4e   :  { %v921_v38 = vadd.f32 0.5, %v919_v46 }
 0xc4f   :  { %v922_v40 = vadd.f32 %v920_v35, %v1605_v11 }
 0xc50   :  { %v923_v54 = vmul.f32 %v921_v38, %v831_v52 }
 0xc51   :  { %v924_v33 = vmul.f32 %v922_v40, %v921_v38 }
 0xc53   :  { %926 = vrot.lane.b32.xlu0 %v924_v33, %s1448_s0 }
 0xcc5   :  { %v927_v47 = vpop.permute.xlu0 %926 }
 0xcc6   :  { %v929_v55 = vadd.f32 %v927_v47, %v923_v54 }
 0xcc8   :  { %1410 = vtanh.f32 %v929_v55 }
 0xcd2   :  { %v1411_v34 = vpop.eup %1410 }
 0xcd3   :  { %v931_v36 = vmul.f32 %v1411_v34, %v922_v40 }
 0xcd5   :  { %938 = vrot.lane.b32.xlu1 %v931_v36, %s1448_s0 }
 0xd47   :  { %v939_v37 = vpop.permute.xlu1 %938 }
 0xd48   :  { %1148 = vmatmul.mubr.msk.f32.vlgmr.msra.gmra.mrb[8].mxu0 %vm252_vm5, %v939_v37 }
 0xe1b   :  { %v1008_v42 = vpop.f32.mrb[8].mxu0 }
 0xe1c   :  { %v1013_v43 = vadd.f32 %v1008_v42, %v198_v39  ;;  %v1010_v44 = vpop.f32.mrb[9].mxu0 }
 0xe1d   :  { %v1014_v45 = vadd.f32 %v1010_v44, %v200_v41 }
 0xe1e   :  { %1412 = vtanh.f32 %v1013_v43 }
 0xe1f   :  { %1414 = vtanh.f32 %v1014_v45 }
 0xe28   :  { %v1413_v50 = vpop.eup %1412 }
 0xe29   :  { %v1415_v53 = vpop.eup %1414  ;;  %v1017_v56 = vmul.f32 0.5, %v1413_v50 }
 0xe2a   :  { %v1018_v57 = vmul.f32 %v1415_v53, %v1603_v7  ;;  %v1318_v7 = vpack.c.bf16 %v1031_v60, %v1030_v59 }
 0xe2b   :  { %v1019_v58 = vadd.f32 0.5, %v1017_v56 }
 0xe2c   :  { %v1020_v63 = vadd.f32 %v1018_v57, %v1605_v11  ;;  %v1033_v11 = vld [vmem:[%s1747_s2 + $0x18] sm:$0xff]  ;;  %1319 = vmatpush3.bf16.msra.mxu1 %v1318_v7 }
 0xe2d   :  { %v1321_v48 = vpack.c.bf16 %v1033_v11, %v1032_v61  ;;  %1320 = vmatprep.subr.bf16.mxu1 %v1449_v62  ;;  %v1021_v6 = vmul.f32 %v1019_v58, %v929_v55 }
 0xe2e   :  { %v1022_v1 = vmul.f32 %v1020_v63, %v1019_v58 }
 0xe30   :  { %1024 = vrot.lane.b32.xlu0 %v1022_v1, %s1448_s0  ;;  %1322 = vmatpush3.bf16.msra.mxu1 %v1321_v48 }
 0xe31   :  { %1323 = vmatprep.subr.bf16.mxu1 %v1449_v62 }
 0xe34   :  { %1325 = vmatpush3.bf16.msra.mxu1 %v1324_v3 }
 0xe35   :  { %1326 = vmatprep.subr.bf16.mxu1 %v1449_v62 }
 0xe38   :  { %1328 = vmatpush3.bf16.msra.mxu1 %v1327_v5 }
 0xea2   :  { %v1025_v8 = vpop.permute.xlu0 %1024 }
 0xea3   :  { %v1027_v9 = vadd.f32 %v1025_v8, %v1021_v6 }
 0xea5   :  { %1416 = vtanh.f32 %v1027_v9 }
 0xeaf   :  { %v1417_v10 = vpop.eup %1416 }
 0xeb0   :  { %v1029_v12 = vmul.f32 %v1417_v10, %v1020_v63 }
 0xeb2   :  { %1044 = vrot.lane.b32.xlu1 %v1029_v12, %s1448_s0 }
 0xf24   :  { %v1045_v13 = vpop.permute.xlu1 %1044 }
 0xf25   :  { %1177 = vmatmul.mubr.msk.f32.vlgmr.msra.gmra.mrb[16].mxu1 %vm252_vm5, %v1045_v13 }
 0xff8   :  { %v1114_v15 = vpop.f32.mrb[16].mxu1 }
 0xff9   :  { %v1115_v16 = vadd.f32 %v1149_v14, %v1114_v15  ;;  %v1178_v18 = vpop.f32.mrb[17].mxu1 }
 0xffb   :  { %1119 = vst.msk [vmem:[%s1748_s3] sm:$0xff] %vm1118_vm7, %v1115_v16 }
 0xffc   :  { %1124 = vsyncpa [#allocation4], 1 }

</bundles_post_ra>
